<compile_context>
chip_gen: v5e
topology: v5e:2x2
jax: 0.10.0
libtpu: 0.0.40
codegen_flags: <defaults>
</compile_context>

<pallas_src>
import functools

import jax
import jax.numpy as jnp
from jax.experimental import pallas as pl
from jax.experimental.pallas import tpu as pltpu


# Dataset statistics from the PyTorch module's __init__
_DATASET_STATS = {
    "CIFAR10": ((0.4914, 0.4822, 0.4465), (0.2023, 0.1994, 0.201)),
    "CIFAR20": ((0.5071, 0.4868, 0.4408), (0.2675, 0.2565, 0.2761)),
    "MNIST": ((0.1307,), (0.3081,)),
    "SVHN": ((0.5,), (0.5,)),
    "FMNIST": ((0.2849,), (0.3516,)),
    "MFMNIST": ((0.2849,), (0.3516,)),
}

_MAX_FEATURE_BLOCK = 512 * 128  # cap on the lane-axis block (elements) for huge images

# Module-level cache of expanded (1, C*H*W) scale/bias device arrays.
_STATS_CACHE = {}


@functools.lru_cache(maxsize=1)
def _tile_params():
    """Return (target tile bytes, vmem_limit_bytes, has_two_tensorcores) per TPU gen."""
    kind = ""
    try:
        kind = jax.devices()[0].device_kind.lower()
    except Exception:  # pragma: no cover - defensive (e.g. odd backends)
        pass
    if "v7" in kind:
        # 3.2 TB/s HBM: bigger tiles amortize the ~0.35us/step overhead; 2 TCs/chip.
        return 5 * 1024 * 1024, 40 << 20, True
    if "v6" in kind:
        return 4 * 1024 * 1024, 32 << 20, False
    # v5e / unknown: conservative tiles, still raise scoped VMEM for headroom.
    return 2 * 1024 * 1024, 24 << 20, False


def _pick_blocks(rows, cols, itemsize, target_bytes, two_tc):
    """Choose (bn, bc) block sizes for a (rows, cols) streaming elementwise op."""
    # Dtype-native sublane packing: 8 for 4-byte, 16 for 2-byte, 32 for 1-byte.
    sublane = max(8, 32 // max(itemsize, 1))

    bc = cols if cols <= _MAX_FEATURE_BLOCK else _MAX_FEATURE_BLOCK

    bn = max(1, target_bytes // max(bc * itemsize, 1))
    bn = min(bn, rows)
    if bn < rows:
        # Must be a multiple of 8 (hard (8,128) constraint); prefer the dtype-native
        # sublane multiple for unmasked stores.  Guards the bn-in-1..7 edge case.
        bn = max(sublane, (bn // sublane) * sublane)
        if bn >= rows:
            bn = rows

    # On dual-TensorCore parts make sure the parallel grid has >=2 programs so both
    # cores get work (otherwise one TC idles for medium-sized batches).
    if two_tc and bn >= rows and pl.cdiv(cols, bc) == 1 and rows > sublane:
        half = pl.cdiv(rows, 2)
        bn2 = ((half + sublane - 1) // sublane) * sublane
        if bn2 < rows:
            bn = bn2

    return bn, bc


def _affine_vec_kernel(scale_ref, bias_ref, x_ref, o_ref):
    # scale_ref / bias_ref: (1, bc) f32, resident across batch blocks.
    # x_ref / o_ref: (bn, bc) tile of the flattened (N, C*H*W) tensor.
    x = x_ref[...].astype(jnp.float32)
    o_ref[...] = (x * scale_ref[...] + bias_ref[...]).astype(o_ref.dtype)


def _make_affine_scalar_kernel(scale, bias):
    # Single-channel datasets: bake the scalar affine into the kernel closure so no
    # scale/bias input streams are DMA'd at all.
    scale = float(scale)
    bias = float(bias)

    def kernel(x_ref, o_ref):
        x = x_ref[...].astype(jnp.float32)
        o_ref[...] = (x * scale + bias).astype(o_ref.dtype)

    return kernel


def _expanded_scale_bias(dataset, hw):
    key = (dataset, hw)
    if key not in _STATS_CACHE:
        mean_t, std_t = _DATASET_STATS[dataset]
        mean = jnp.asarray(mean_t, jnp.float32)
        std = jnp.asarray(std_t, jnp.float32)
        scale = jnp.repeat(1.0 / std, hw).reshape(1, -1)
        bias = jnp.repeat(-mean / std, hw).reshape(1, -1)
        _STATS_CACHE[key] = (scale, bias)
    return _STATS_CACHE[key]


def normalizer_forward(x, dataset="CIFAR10", out_dtype=None):
    """Pallas equivalent of normalizer(dataset)(x) for NCHW float input."""
    if dataset not in _DATASET_STATS:
        raise ValueError("nothing is specified for normalizer!")
    mean_t, std_t = _DATASET_STATS[dataset]
    N, C, H, W = x.shape
    assert C == len(mean_t), f"expected {len(mean_t)} channels for {dataset}, got {C}"

    HW = H * W
    CHW = C * HW

    if out_dtype is None:
        # Preserve floating input dtype; promote integer inputs to f32 instead of
        # silently truncating normalized values.
        out_dtype = x.dtype if jnp.issubdtype(x.dtype, jnp.floating) else jnp.float32
    out_dtype = jnp.dtype(out_dtype)

    target_bytes, vmem_limit, two_tc = _tile_params()
    itemsize = jnp.dtype(x.dtype).itemsize
    cparams = pltpu.CompilerParams(
        # Both axes independent -> shards across v7x's two TensorCores; no-op on
        # single-core v5e/v6e.
        dimension_semantics=("parallel", "parallel"),
        vmem_limit_bytes=vmem_limit,
    )

    if C == 1:
        # Scalar affine: no per-channel structure, so any contiguous flattening is
        # valid.  Pick a lane-dense one when C*H*W isn't a multiple of 128 (MNIST 784)
        # to avoid masked partial stores on every row.
        scale_s = 1.0 / std_t[0]
        bias_s = -mean_t[0] / std_t[0]
        total = N * CHW
        rows, cols = N, CHW
        if CHW % 128 != 0:
            for lane in (4096, 2048, 1024, 512, 256, 128):
                if total % lane == 0:
                    rows, cols = total // lane, lane
                    break
        x2 = x.reshape(rows, cols)
        bn, bc = _pick_blocks(rows, cols, itemsize, target_bytes, two_tc)
        grid = (pl.cdiv(rows, bn), pl.cdiv(cols, bc))
        out = pl.pallas_call(
            _make_affine_scalar_kernel(scale_s, bias_s),
            out_shape=jax.ShapeDtypeStruct((rows, cols), out_dtype),
            grid_spec=pl.GridSpec(
                grid=grid,
                in_specs=[pl.BlockSpec((bn, bc), lambda i, j: (i, j))],
                out_specs=pl.BlockSpec((bn, bc), lambda i, j: (i, j)),
            ),
            compiler_params=cparams,
        )(x2)
        return out.reshape(N, C, H, W)

    # Multi-channel path: resident (1, C*H*W) scale/bias vectors, cached per dataset.
    scale, bias = _expanded_scale_bias(dataset, HW)
    x2 = x.reshape(N, CHW)  # free view for contiguous NCHW
    bn, bc = _pick_blocks(N, CHW, itemsize, target_bytes, two_tc)
    grid = (pl.cdiv(N, bn), pl.cdiv(CHW, bc))

    out = pl.pallas_call(
        _affine_vec_kernel,
        out_shape=jax.ShapeDtypeStruct((N, CHW), out_dtype),
        grid_spec=pl.GridSpec(
            grid=grid,
            in_specs=[
                pl.BlockSpec((1, bc), lambda i, j: (0, j)),    # scale (resident)
                pl.BlockSpec((1, bc), lambda i, j: (0, j)),    # bias  (resident)
                pl.BlockSpec((bn, bc), lambda i, j: (i, j)),   # x tile
            ],
            out_specs=pl.BlockSpec((bn, bc), lambda i, j: (i, j)),
        ),
        compiler_params=cparams,
    )(scale, bias, x2)

    return out.reshape(N, C, H, W)


if __name__ == "__main__":
    key = jax.random.PRNGKey(0)

    # CIFAR10-like input: batch=2, channels=3, spatial=16x16, NCHW.
    x = jax.random.uniform(key, (2, 3, 16, 16), dtype=jnp.float32)
    y = normalizer_forward(x, dataset="CIFAR10")
    y = jax.block_until_ready(y)

    mean = jnp.asarray((0.4914, 0.4822, 0.4465), jnp.float32).reshape(1, 3, 1, 1)
    std = jnp.asarray((0.2023, 0.1994, 0.201), jnp.float32).reshape(1, 3, 1, 1)
    ref = (x - mean) / std
    assert y.shape == x.shape and y.dtype == x.dtype
    assert jnp.max(jnp.abs(y - ref)) < 1e-5

    # MNIST-like single-channel input exercises the scalar-closure kernel path.
    xm = jax.random.uniform(jax.random.PRNGKey(0), (2, 1, 16, 16), dtype=jnp.float32)
    ym = jax.block_until_ready(normalizer_forward(xm, dataset="MNIST"))
    refm = (xm - 0.1307) / 0.3081
    assert ym.shape == xm.shape and ym.dtype == xm.dtype
    assert jnp.max(jnp.abs(ym - refm)) < 1e-5

    print("KERNEL_OK")
</pallas_src>

<mosaic_0001>
module attributes {stable_mosaic.version = 11 : i64} {
  func.func @_affine_vec_kernel(%arg0: i32, %arg1: i32, %arg2: memref<1x768xf32, #tpu.memory_space<vmem>>, %arg3: memref<1x768xf32, #tpu.memory_space<vmem>>, %arg4: memref<2x768xf32, #tpu.memory_space<vmem>>, %arg5: memref<2x768xf32, #tpu.memory_space<vmem>>) attributes {dimension_semantics = [#tpu.dimension_semantics<parallel>, #tpu.dimension_semantics<parallel>], iteration_bounds = array<i64: 1, 1>, scalar_prefetch = 0 : i64, scratch_operands = 0 : i64, tpu.core_type = #tpu.core_type<tc>, window_params = [{transform_indices = @transform_0, window_bounds = array<i64: 1, 768>}, {transform_indices = @transform_1, window_bounds = array<i64: 1, 768>}, {transform_indices = @transform_2, window_bounds = array<i64: 2, 768>}, {transform_indices = @transform_3, window_bounds = array<i64: 2, 768>}]} {
    %c0 = arith.constant 0 : index
    %c0_0 = arith.constant 0 : index
    %0 = vector.load %arg4[%c0, %c0_0] : memref<2x768xf32, #tpu.memory_space<vmem>>, vector<2x768xf32>
    %c0_1 = arith.constant 0 : index
    %c0_2 = arith.constant 0 : index
    %1 = vector.load %arg2[%c0_1, %c0_2] : memref<1x768xf32, #tpu.memory_space<vmem>>, vector<1x768xf32>
    %2 = vector.broadcast %1 : vector<1x768xf32> to vector<2x768xf32>
    %3 = arith.mulf %0, %2 : vector<2x768xf32>
    %c0_3 = arith.constant 0 : index
    %c0_4 = arith.constant 0 : index
    %4 = vector.load %arg3[%c0_3, %c0_4] : memref<1x768xf32, #tpu.memory_space<vmem>>, vector<1x768xf32>
    %5 = vector.broadcast %4 : vector<1x768xf32> to vector<2x768xf32>
    %6 = arith.addf %3, %5 : vector<2x768xf32>
    %c0_5 = arith.constant 0 : index
    %c0_6 = arith.constant 0 : index
    %7 = vector.load %arg5[%c0_5, %c0_6] : memref<2x768xf32, #tpu.memory_space<vmem>>, vector<2x768xf32>
    tpu.vector_store %arg5[%c0_5, %c0_6], %6 {strides = array<i32>} : memref<2x768xf32, #tpu.memory_space<vmem>>, vector<2x768xf32>,
    return
  }
  func.func @transform_0(%arg0: i32, %arg1: i32) -> (i32, i32) {
    %c0_i32 = arith.constant 0 : i32
    %c0_i32_0 = arith.constant 0 : i32
    return %c0_i32, %arg1 : i32, i32
  }
  func.func @transform_1(%arg0: i32, %arg1: i32) -> (i32, i32) {
    %c0_i32 = arith.constant 0 : i32
    %c0_i32_0 = arith.constant 0 : i32
    return %c0_i32, %arg1 : i32, i32
  }
  func.func @transform_2(%arg0: i32, %arg1: i32) -> (i32, i32) {
    %c0_i32 = arith.constant 0 : i32
    return %arg0, %arg1 : i32, i32
  }
  func.func @transform_3(%arg0: i32, %arg1: i32) -> (i32, i32) {
    %c0_i32 = arith.constant 0 : i32
    return %arg0, %arg1 : i32, i32
  }
}

</mosaic_0001>

<bundles_post_ra>
// kernel: tpu_custom_call.1
= control target key start
LH: loop header
LB: loop body
LE: loop exit
PB: predicated region body
PF: predicated region fallthrough
CT: control target
= control target key end

     0   :  { %8 = vsyncpa [#allocation3], 0  ;;  %s271_s0 = inlined_call_operand.hbm [shape: f32[1,768], index: 0, kind: input, shape index: {}]   ;;  %s272_s1 = inlined_call_operand.hbm [shape: f32[1,768], index: 1, kind: input, shape index: {}]   ;;  %s273_s2 = inlined_call_operand.hbm [shape: f32[2,768], index: 2, kind: input, shape index: {}]   ;;  %s274_s3 = inlined_call_operand.hbm [shape: f32[2,768], index: 3, kind: output, shape index: {}]  }
   0x1   :  { %9 = vsyncpa [#allocation6], 0  ;;  %s27_s14 = sshll.u32 %s272_s1, 4  ;;  %s28_s14 = int_to_ptr.hbm [resolvable:$true] %s27_s14 }
   0x2   :  { %10 = vsyncpa [#allocation4], 0  ;;  %s227_s15 = smov [#allocation5]   ;;  %s16_s19 = sshll.u32 %s271_s0, 4  ;;  %s17_s19 = int_to_ptr.hbm [resolvable:$true] %s16_s19 }
   0x3   :  { %s29_s16 = sshll.u32 %s227_s15, 4  ;;  %s228_s20 = smov [#allocation2]   ;;  %s30_s16 = int_to_ptr.vmem [resolvable:$true] %s29_s16 }
   0x4   :  { %32 = dma.hbm_to_vmem [thread:$0]  %s28_s14, 96, %s30_s16, [#allocation6]  }
   0x5   :  { %s18_s21 = sshll.u32 %s228_s20, 4  ;;  %s38_s24 = sshll.u32 %s273_s2, 4  ;;  %s19_s21 = int_to_ptr.vmem [resolvable:$true] %s18_s21  ;;  %s39_s24 = int_to_ptr.hbm [resolvable:$true] %s38_s24 }
   0x6   :  { %21 = dma.hbm_to_vmem [thread:$0]  %s17_s19, 96, %s19_s21, [#allocation3]  }
   0x7   :  { %s229_s1 = smov [#allocation7]  }
   0x8   :  { %s40_s25 = sshll.u32 %s229_s1, 4  ;;  %s41_s25 = int_to_ptr.vmem [resolvable:$true] %s40_s25 }
   0x9   :  { %43 = dma.hbm_to_vmem [thread:$0]  %s39_s24, 192, %s41_s25, [#allocation6]  }
   0xa   :  { %221 = dma.done.wait [#allocation3], 96  }
   0xb   :  { %222 = vsyncadd [#allocation3], 4294967200 }
   0xc   :  { %223 = dma.done.wait [#allocation6], 288  }
   0xd   :  { %224 = vsyncadd [#allocation6], 4294967008  ;;  %vm70_vm0 = vcmask 1041408   ;;  %v58_v0 = vld [vmem:[#allocation2] sm:$0x3f]  ;;  %vm72_vm1 = vcmask 1045508  }
   0xe   :  { %vm74_vm2 = vcmask 1043456   ;;  %v81_v1 = vld [vmem:[#allocation5] sm:$0x3f]  ;;  %v60_v2 = vperm.slane %v58_v0, 0  ;;  %v61_v3 = vperm.slane %v58_v0, 1  ;;  %v62_v4 = vperm.slane %v58_v0, 2 }
   0xf   :  { %v63_v5 = vperm.slane %v58_v0, 3  ;;  %v83_v6 = vperm.slane %v81_v1, 0  ;;  %v84_v7 = vperm.slane %v81_v1, 1  ;;  %v85_v8 = vperm.slane %v81_v1, 2  ;;  %v56_v14 = vld [vmem:[#allocation7] sm:$0xff]  ;;  %s230_s0 = smov [#allocation8]  }
  0x10   :  { %v86_v9 = vperm.slane %v81_v1, 3  ;;  %v66_v10 = vrot.slane %v61_v3, 6  ;;  %v67_v11 = vrot.slane %v62_v4, 4  ;;  %v64_v13 = vperm.slane %v58_v0, 4  ;;  %v57_v26 = vld [vmem:[#allocation7 + $0x8] sm:$0xf] }
  0x11   :  { %v68_v12 = vrot.slane %v63_v5, 2  ;;  %v89_v15 = vrot.slane %v84_v7, 6  ;;  %v90_v16 = vrot.slane %v85_v8, 4  ;;  %v65_v18 = vperm.slane %v58_v0, 5  ;;  %s108_s2 = sshll.u32 %s230_s0, 4  ;;  %s110_s28 = sshll.u32 %s274_s3, 4  ;;  %s109_s2 = int_to_ptr.vmem [resolvable:$true] %s108_s2  ;;  %s111_s28 = int_to_ptr.hbm [resolvable:$true] %s110_s28 }
  0x12   :  { %v91_v17 = vrot.slane %v86_v9, 2  ;;  %v71_v19 = vsel %vm70_vm0, %v60_v2, %v66_v10  ;;  %v87_v21 = vperm.slane %v81_v1, 4  ;;  %v88_v22 = vperm.slane %v81_v1, 5 }
  0x13   :  { %v73_v20 = vsel %vm72_vm1, %v67_v11, %v68_v12  ;;  %v93_v24 = vsel %vm70_vm0, %v83_v6, %v89_v15  ;;  %v69_v27 = vrot.slane %v65_v18, 6 }
  0x14   :  { %v75_v23 = vsel %vm74_vm2, %v71_v19, %v73_v20  ;;  %v94_v25 = vsel %vm72_vm1, %v90_v16, %v91_v17  ;;  %v92_v30 = vrot.slane %v88_v22, 6 }
  0x15   :  { %v79_v28 = vmul.f32 %v75_v23, %v56_v14  ;;  %v95_v29 = vsel %vm74_vm2, %v93_v24, %v94_v25  ;;  %v76_v31 = vsel %vm70_vm0, %v64_v13, %v69_v27 }
  0x16   :  { %v80_v33 = vmul.f32 %v76_v31, %v57_v26  ;;  %v96_v34 = vsel %vm70_vm0, %v87_v21, %v92_v30 }
  0x17   :  { %v99_v32 = vadd.f32 %v95_v29, %v79_v28 }
  0x18   :  { %v100_v35 = vadd.f32 %v96_v34, %v80_v33 }
  0x19   :  { %101 = vst [vmem:[#allocation8] sm:$0xff] %v99_v32 }
  0x1a   :  { %102 = vst [vmem:[#allocation8 + $0x8] sm:$0xf] %v100_v35 }
  0x1b   :  { %113 = dma.vmem_to_hbm [thread:$0]  %s109_s2, 192, %s111_s28, [#allocation4]  }
  0x1c   :  { %225 = dma.done.wait [#allocation4], 192  }
  0x1d   :  { %226 = vsyncadd [#allocation4], 4294967104 }
  0x1e   :  { %118 = vsyncpa [#allocation3], 1 }
  0x1f   :  { %119 = vsyncpa [#allocation6], 1 }
  0x20   :  { %120 = vsyncpa [#allocation4], 1 }

</bundles_post_ra>
